<compile_context>
chip_gen: v6e
topology: v6e:2x2x1
jax: 0.10.0
libtpu: 0.0.40
codegen_flags: <defaults>
</compile_context>

<pallas_src>
import functools

import jax
import jax.numpy as jnp
from jax.experimental import pallas as pl
from jax.experimental.pallas import tpu as pltpu

LANES = 128        # lane width of a vreg
TM_TARGET = 2048   # rows per grid chunk -> (2048, 128) f32 = 1 MiB per input block


def _edge_loss_kernel(x_ref, t_ref, out_ref, *, tm, num_valid, needs_mask):
    """One chunk: writes per-lane partials [pos_cnt, neg_cnt, pos_bce, neg_bce] as (4, 128)."""
    x = x_ref[...].astype(jnp.float32)
    t = t_ref[...].astype(jnp.float32)

    pos = t == 1.0   # target == 1
    neg = t == 0.0   # target == 0
    # target > 1 is "ignore": weight 0 -> simply excluded from both masks.

    if needs_mask:
        # Mask the ragged tail / partial last block.  Out-of-bounds block data
        # is unspecified, so we select (where) instead of multiplying by a mask.
        i = pl.program_id(0)
        row = jax.lax.broadcasted_iota(jnp.int32, (tm, LANES), 0)
        lane = jax.lax.broadcasted_iota(jnp.int32, (tm, LANES), 1)
        flat = (i * tm + row) * LANES + lane
        valid = flat < num_valid
        pos = jnp.logical_and(pos, valid)
        neg = jnp.logical_and(neg, valid)

    # binary_cross_entropy_with_logits (numerically stable form):
    #   max(x, 0) - x*t + log(1 + exp(-|x|))
    bce = jnp.maximum(x, 0.0) - x * t + jnp.log1p(jnp.exp(-jnp.abs(x)))

    zero = jnp.float32(0.0)
    one = jnp.float32(1.0)
    # Per-lane partial sums (reduce only over the sublane/row axis).
    pos_cnt = jnp.sum(jnp.where(pos, one, zero), axis=0, keepdims=True)   # (1, 128)
    neg_cnt = jnp.sum(jnp.where(neg, one, zero), axis=0, keepdims=True)
    pos_bce = jnp.sum(jnp.where(pos, bce, zero), axis=0, keepdims=True)
    neg_bce = jnp.sum(jnp.where(neg, bce, zero), axis=0, keepdims=True)

    out_ref[0, :, :] = jnp.concatenate([pos_cnt, neg_cnt, pos_bce, neg_bce], axis=0)


def _cal(logits, target):
    """Single-scale EdgeLoss.cal: weighted BCE-with-logits, mean over all elems."""
    n, c, h, w = logits.shape
    num = n * c * h * w

    rows = pl.cdiv(num, LANES)
    padded = rows * LANES

    if padded == num:
        # Pure reshape (no cast, no copy) to a lane-dense slab.
        x2 = jnp.reshape(logits, (rows, LANES))
        t2 = jnp.reshape(target, (rows, LANES))
    else:
        # TODO(synk): this tail pad materializes a copy; only hit when
        # n*c*h*w is not a multiple of 128 (pad target with 2.0 => "ignore").
        x2 = jnp.pad(jnp.reshape(logits, (-1,)), (0, padded - num)).reshape(rows, LANES)
        t2 = jnp.pad(jnp.reshape(target, (-1,)), (0, padded - num),
                     constant_values=2).reshape(rows, LANES)

    tm = rows if rows < TM_TARGET else TM_TARGET
    num_chunks = pl.cdiv(rows, tm)
    needs_mask = (padded != num) or (rows % tm != 0)

    kernel = functools.partial(
        _edge_loss_kernel, tm=tm, num_valid=num, needs_mask=needs_mask)

    partials = pl.pallas_call(
        kernel,
        out_shape=jax.ShapeDtypeStruct((num_chunks, 4, LANES), jnp.float32),
        grid_spec=pltpu.PrefetchScalarGridSpec(
            num_scalar_prefetch=0,
            grid=(num_chunks,),
            in_specs=[
                pl.BlockSpec((tm, LANES), lambda i: (i, 0)),
                pl.BlockSpec((tm, LANES), lambda i: (i, 0)),
            ],
            out_specs=pl.BlockSpec((1, 4, LANES), lambda i: (i, 0, 0)),
        ),
        compiler_params=pltpu.CompilerParams(
            dimension_semantics=("parallel",),
        ),
    )(x2, t2)

    sums = jnp.sum(partials, axis=(0, 2))          # (4,)
    pos_num, neg_num = sums[0], sums[1]
    pos_bce, neg_bce = sums[2], sums[3]
    sum_num = pos_num + neg_num

    # weight[pos] = neg_num/sum_num, weight[neg] = pos_num/sum_num, ignore -> 0
    # size_average=True => mean over *all* elements (ignored ones count in N).
    return (pos_bce * neg_num + neg_bce * pos_num) / sum_num / jnp.float32(num)


def edge_loss(inputs, target):
    """EdgeLoss.forward: accepts a single NCHW array or a list of them."""
    if isinstance(inputs, (list, tuple)):
        loss = jnp.float32(0.0)
        for inp in inputs:
            # TODO(synk): jax.image.resize 'nearest' index rounding can differ by
            # at most one pixel from F.interpolate(mode='nearest') on some sizes.
            new_target = jax.image.resize(
                target, target.shape[:2] + inp.shape[2:], method="nearest"
            )
            loss = loss + _cal(inp, new_target)
        return loss
    return _cal(inputs, target)


def _reference_loss(x, t):
    """Pure-JAX reference of EdgeLoss.cal for verification."""
    xf = x.reshape(-1).astype(jnp.float32)
    tf = t.reshape(-1).astype(jnp.float32)
    pos = tf == 1.0
    neg = tf == 0.0
    pos_num = jnp.sum(pos).astype(jnp.float32)
    neg_num = jnp.sum(neg).astype(jnp.float32)
    sum_num = pos_num + neg_num
    w = jnp.where(pos, neg_num / sum_num, jnp.where(neg, pos_num / sum_num, 0.0))
    bce = jnp.maximum(xf, 0.0) - xf * tf + jnp.log1p(jnp.exp(-jnp.abs(xf)))
    return jnp.mean(w * bce)


if __name__ == "__main__":
    key = jax.random.PRNGKey(0)
    k1, k2 = jax.random.split(key)

    # NCHW, small shapes: batch=2, channels=4, spatial=16x16
    x = jax.random.normal(k1, (2, 4, 16, 16), dtype=jnp.float32)          # logits
    t = jax.random.randint(k2, (2, 4, 16, 16), 0, 3).astype(jnp.float32)  # {0,1,2}: neg/pos/ignore

    loss = edge_loss(x, t)
    loss = jax.block_until_ready(loss)

    ref = _reference_loss(x, t)
    assert jnp.allclose(loss, ref, rtol=1e-5, atol=1e-6), (float(loss), float(ref))

    print("KERNEL_OK")
</pallas_src>

<mosaic_0001>
module attributes {stable_mosaic.version = 11 : i64} {
  func.func @_edge_loss_kernel(%arg0: i32, %arg1: memref<16x128xf32, #tpu.memory_space<vmem>>, %arg2: memref<16x128xf32, #tpu.memory_space<vmem>>, %arg3: memref<1x4x128xf32, #tpu.memory_space<vmem>>) attributes {dimension_semantics = [#tpu.dimension_semantics<parallel>], iteration_bounds = array<i64: 1>, scalar_prefetch = 0 : i64, scratch_operands = 0 : i64, tpu.core_type = #tpu.core_type<tc>, window_params = [{transform_indices = @transform_0, window_bounds = array<i64: 16, 128>}, {transform_indices = @transform_1, window_bounds = array<i64: 16, 128>}, {transform_indices = @transform_2, window_bounds = array<i64: 1, 4, 128>}]} {
    %c0 = arith.constant 0 : index
    %c0_0 = arith.constant 0 : index
    %0 = vector.load %arg1[%c0, %c0_0] : memref<16x128xf32, #tpu.memory_space<vmem>>, vector<16x128xf32>
    %c0_1 = arith.constant 0 : index
    %c0_2 = arith.constant 0 : index
    %1 = vector.load %arg2[%c0_1, %c0_2] : memref<16x128xf32, #tpu.memory_space<vmem>>, vector<16x128xf32>
    %cst = arith.constant 1.000000e+00 : f32
    %2 = vector.broadcast %cst : f32 to vector<16x128xf32>
    %3 = arith.cmpf oeq, %1, %2 : vector<16x128xf32>
    %cst_3 = arith.constant 0.000000e+00 : f32
    %4 = vector.broadcast %cst_3 : f32 to vector<16x128xf32>
    %5 = arith.cmpf oeq, %1, %4 : vector<16x128xf32>
    %cst_4 = arith.constant 0.000000e+00 : f32
    %6 = vector.broadcast %cst_4 : f32 to vector<16x128xf32>
    %7 = arith.maximumf %0, %6 : vector<16x128xf32>
    %8 = arith.mulf %0, %1 : vector<16x128xf32>
    %9 = arith.subf %7, %8 : vector<16x128xf32>
    %10 = math.absf %0 : vector<16x128xf32>
    %cst_5 = arith.constant 0.000000e+00 : f32
    %11 = vector.broadcast %cst_5 : f32 to vector<16x128xf32>
    %12 = arith.subf %11, %10 : vector<16x128xf32>
    %13 = math.exp %12 : vector<16x128xf32>
    %14 = math.log1p %13 : vector<16x128xf32>
    %15 = arith.addf %9, %14 : vector<16x128xf32>
    %cst_6 = arith.constant 1.000000e+00 : f32
    %cst_7 = arith.constant 0.000000e+00 : f32
    %16 = vector.broadcast %cst_6 : f32 to vector<16x128xf32>
    %17 = vector.broadcast %cst_7 : f32 to vector<16x128xf32>
    %18 = arith.select %3, %16, %17 : vector<16x128xi1>, vector<16x128xf32>
    %cst_8 = arith.constant dense<0.000000e+00> : vector<128xf32>
    %19 = vector.multi_reduction <add>, %18, %cst_8 [0] : vector<16x128xf32> to vector<128xf32>
    %20 = vector.shape_cast %19 : vector<128xf32> to vector<1x128xf32>
    %cst_9 = arith.constant 1.000000e+00 : f32
    %cst_10 = arith.constant 0.000000e+00 : f32
    %21 = vector.broadcast %cst_9 : f32 to vector<16x128xf32>
    %22 = vector.broadcast %cst_10 : f32 to vector<16x128xf32>
    %23 = arith.select %5, %21, %22 : vector<16x128xi1>, vector<16x128xf32>
    %cst_11 = arith.constant dense<0.000000e+00> : vector<128xf32>
    %24 = vector.multi_reduction <add>, %23, %cst_11 [0] : vector<16x128xf32> to vector<128xf32>
    %25 = vector.shape_cast %24 : vector<128xf32> to vector<1x128xf32>
    %cst_12 = arith.constant 0.000000e+00 : f32
    %26 = vector.broadcast %cst_12 : f32 to vector<16x128xf32>
    %27 = arith.select %3, %15, %26 : vector<16x128xi1>, vector<16x128xf32>
    %cst_13 = arith.constant dense<0.000000e+00> : vector<128xf32>
    %28 = vector.multi_reduction <add>, %27, %cst_13 [0] : vector<16x128xf32> to vector<128xf32>
    %29 = vector.shape_cast %28 : vector<128xf32> to vector<1x128xf32>
    %cst_14 = arith.constant 0.000000e+00 : f32
    %30 = vector.broadcast %cst_14 : f32 to vector<16x128xf32>
    %31 = arith.select %5, %15, %30 : vector<16x128xi1>, vector<16x128xf32>
    %cst_15 = arith.constant dense<0.000000e+00> : vector<128xf32>
    %32 = vector.multi_reduction <add>, %31, %cst_15 [0] : vector<16x128xf32> to vector<128xf32>
    %33 = vector.shape_cast %32 : vector<128xf32> to vector<1x128xf32>
    %34 = tpu.concatenate %20, %25, %29, %33 in 0 : vector<1x128xf32>, vector<1x128xf32>, vector<1x128xf32>, vector<1x128xf32> -> vector<4x128xf32>
    %c0_16 = arith.constant 0 : index
    %c0_17 = arith.constant 0 : index
    %c0_18 = arith.constant 0 : index
    %35 = vector.load %arg3[%c0_16, %c0_17, %c0_18] : memref<1x4x128xf32, #tpu.memory_space<vmem>>, vector<1x4x128xf32>
    %36 = vector.shape_cast %35 : vector<1x4x128xf32> to vector<4x128xf32>
    %37 = vector.shape_cast %34 : vector<4x128xf32> to vector<1x4x128xf32>
    tpu.vector_store %arg3[%c0_16, %c0_17, %c0_18], %37 {strides = array<i32>} : memref<1x4x128xf32, #tpu.memory_space<vmem>>, vector<1x4x128xf32>,
    return
  }
  func.func @transform_0(%arg0: i32) -> (i32, i32) {
    %c0_i32 = arith.constant 0 : i32
    %c0_i32_0 = arith.constant 0 : i32
    return %arg0, %c0_i32 : i32, i32
  }
  func.func @transform_1(%arg0: i32) -> (i32, i32) {
    %c0_i32 = arith.constant 0 : i32
    %c0_i32_0 = arith.constant 0 : i32
    return %arg0, %c0_i32 : i32, i32
  }
  func.func @transform_2(%arg0: i32) -> (i32, i32, i32) {
    %c0_i32 = arith.constant 0 : i32
    %c0_i32_0 = arith.constant 0 : i32
    %c0_i32_1 = arith.constant 0 : i32
    return %arg0, %c0_i32, %c0_i32_0 : i32, i32, i32
  }
}

</mosaic_0001>

<bundles_post_ra>
// kernel: tpu_custom_call.1
= control target key start
LH: loop header
LB: loop body
LE: loop exit
PB: predicated region body
PF: predicated region fallthrough
CT: control target
= control target key end

     0   :  { %7 = vsyncpa [#allocation3], 0  ;;  %s259_s0 = inlined_call_operand.hbm [shape: f32[16,128], index: 0, kind: input, shape index: {}]   ;;  %s260_s1 = inlined_call_operand.hbm [shape: f32[16,128], index: 1, kind: input, shape index: {}]   ;;  %s261_s2 = inlined_call_operand.hbm [shape: f32[1,4,128], index: 2, kind: output, shape index: {}]  }
   0x1   :  { %8 = vsyncpa [#allocation6], 0 }
   0x2   :  { %9 = vsyncpa [#allocation4], 0  ;;  %s221_s9 = smov [#allocation2]  }
   0x3   :  { %s15_s10 = sshll.u32 %s221_s9, 4  ;;  %s16_s10 = int_to_ptr.vmem [resolvable:$true] %s15_s10 }
   0x4   :  { %s163_s11 = scalar_lea.vmem %s16_s10, 256  ;;  %p168_p1 = scmp.lt.s32.totalorder %s16_s10, %s16_s10 }
   0x5   :  { %p164_p0 = scmp.ne.s32.totalorder %s16_s10, %s163_s11  ;;  %p169_p2 = scmp.lt.s32.totalorder %s163_s11, %s163_s11 }
   0x7   :  { %p170_p3 = por %p169_p2, %p168_p1 }
   0x9   :  { %p171_p4 = pnand %p170_p3, %p164_p0 }
   0xb   :  { %174 = shalt.err (!%p171_p4)
}
   0xc   :  { %s222_s12 = smov 128   ;;  %s223_s13 = smov 8  }
   0xd   :  { %21 = dma.hbm_to_vmem [thread:$0]  %s259_s0, 256, %s16_s10, [#allocation3], %s222_s12, %s222_s12, %s223_s13  }
   0xe   :  { %s224_s16 = smov [#allocation5]  }
   0xf   :  { %s27_s17 = sshll.u32 %s224_s16, 4  ;;  %s28_s17 = int_to_ptr.vmem [resolvable:$true] %s27_s17 }
  0x10   :  { %s183_s18 = scalar_lea.vmem %s28_s17, 256  ;;  %p188_p6 = scmp.lt.s32.totalorder %s28_s17, %s28_s17 }
  0x11   :  { %p184_p5 = scmp.ne.s32.totalorder %s28_s17, %s183_s18  ;;  %p189_p7 = scmp.lt.s32.totalorder %s183_s18, %s183_s18 }
  0x13   :  { %p190_p8 = por %p189_p7, %p188_p6 }
  0x15   :  { %p191_p9 = pnand %p190_p8, %p184_p5 }
  0x17   :  { %194 = shalt.err (!%p191_p9)
}
  0x18   :  { %33 = dma.hbm_to_vmem [thread:$0]  %s260_s1, 256, %s28_s17, [#allocation6], %s222_s12, %s222_s12, %s223_s13  }
  0x19   :  { %215 = dma.done.wait [#allocation3], 256  }
  0x1a   :  { %216 = vsyncadd [#allocation3], 4294967040 }
  0x1b   :  { %217 = dma.done.wait [#allocation6], 256  }
  0x1c   :  { %218 = vsyncadd [#allocation6], 4294967040  ;;  %v40_v0 = vld [vmem:[#allocation2] sm:$0xff]  ;;  %v41_v1 = vld [vmem:[#allocation2 + $0x8] sm:$0xff]  ;;  %v225_v14 = vmov 0.0   ;;  %vm118_vm6 = vcmask 1040384  }
  0x1d   :  { %v54_v2 = vand.u32 2147483647, %v40_v0  ;;  %v55_v3 = vand.u32 2147483647, %v41_v1  ;;  %v42_v8 = vld [vmem:[#allocation5] sm:$0xff]  ;;  %v43_v10 = vld [vmem:[#allocation5 + $0x8] sm:$0xff] }
  0x1e   :  { %vm44_vm0 = vcmp.eq.f32.partialorder %v42_v8, 1.0  ;;  %vm45_vm1 = vcmp.eq.f32.partialorder %v43_v10, 1.0  ;;  %vm46_vm2 = vcmp.eq.f32.partialorder %v42_v8, 0.0  ;;  %vm47_vm3 = vcmp.eq.f32.partialorder %v43_v10, 0.0  ;;  %s226_s0 = smov [#allocation7]  }
  0x1f   :  { %v56_v4 = vsub.f32 0.0, %v54_v2  ;;  %v57_v5 = vsub.f32 0.0, %v55_v3  ;;  %v82_v15 = vsel %vm44_vm0, 1.0, %v225_v14  ;;  %v83_v16 = vsel %vm45_vm1, 1.0, %v225_v14  ;;  %s131_s1 = sshll.u32 %s226_s0, 4  ;;  %s132_s1 = int_to_ptr.vmem [resolvable:$true] %s131_s1 }
  0x20   :  { %v91_v17 = vsel %vm46_vm2, 1.0, %v225_v14  ;;  %v92_v18 = vsel %vm47_vm3, 1.0, %v225_v14  ;;  %v84_v20 = vadd.f32 %v83_v16, %v82_v15  ;;  %v48_v26 = vmax.f32 %v40_v0, 0.0  ;;  %s195_s21 = scalar_lea.vmem %s132_s1, 64  ;;  %p200_p11 = scmp.lt.s32.totalorder %s132_s1, %s132_s1 }
  0x21   :  { %v58_v6 = vmul.f32 1.442695, %v56_v4  ;;  %v60_v7 = vmul.f32 1.442695, %v57_v5  ;;  %v93_v21 = vadd.f32 %v92_v18, %v91_v17  ;;  %v50_v27 = vmul.f32 %v42_v8, %v40_v0  ;;  %p196_p10 = scmp.ne.s32.totalorder %s132_s1, %s195_s21  ;;  %p201_p12 = scmp.lt.s32.totalorder %s195_s21, %s195_s21 }
  0x22   :  { %v85_v24 = vrot.slane %v84_v20, 4  ;;  %v49_v30 = vmax.f32 %v41_v1, 0.0  ;;  %v51_v31 = vmul.f32 %v43_v10, %v41_v1  ;;  %vm120_vm7 = vcmask 1041408  }
  0x23   :  { %147 = vpow2.f32 %v58_v6  ;;  %v94_v25 = vrot.slane %v93_v21, 4  ;;  %v52_v37 = vsub.f32 %v48_v26, %v50_v27  ;;  %vm122_vm8 = vcmask 1042432   ;;  %p202_p13 = por %p201_p12, %p200_p11 }
  0x24   :  { %149 = vpow2.f32 %v60_v7  ;;  %v86_v34 = vadd.f32 %v85_v24, %v84_v20  ;;  %v53_v40 = vsub.f32 %v49_v30, %v51_v31 }
  0x25   :  { %v95_v35 = vadd.f32 %v94_v25, %v93_v21  ;;  %p203_p0 = pnand %p202_p13, %p196_p10 }
  0x26   :  { %v87_v44 = vrot.slane %v86_v34, 2 }
  0x27   :  { %v96_v45 = vrot.slane %v95_v35, 2 }
  0x28   :  { %v88_v51 = vadd.f32 %v87_v44, %v86_v34 }
  0x29   :  { %v97_v52 = vadd.f32 %v96_v45, %v95_v35 }
  0x2a   :  { %v89_v59 = vrot.slane %v88_v51, 1 }
  0x2b   :  { %v98_v60 = vrot.slane %v97_v52, 1 }
  0x2c   :  { %v90_v1 = vadd.f32 %v89_v59, %v88_v51 }
  0x2d   :  { %v99_v2 = vadd.f32 %v98_v60, %v97_v52 }
  0x2f   :  { %v119_v7 = vsel %vm118_vm6, %v90_v1, %v99_v2 }
  0x30   :  { %v148_v9 = vpop.eup %147 }
  0x31   :  { %v150_v11 = vpop.eup %149  ;;  %v62_v12 = vadd.f32 1.0, %v148_v9  ;;  %v65_v19 = vmul.f32 -0.5, %v148_v9  ;;  %v68_v28 = vand.u32 2147483647, %v148_v9 }
  0x32   :  { %v71_v13 = vadd.f32 1.0, %v150_v11  ;;  %v74_v22 = vmul.f32 -0.5, %v150_v11  ;;  %v77_v32 = vand.u32 2147483647, %v150_v11 }
  0x33   :  { %151 = vlog2.f32 %v62_v12  ;;  %v66_v23 = vadd.f32 1.0, %v65_v19  ;;  %vm69_vm4 = vcmp.lt.f32.partialorder %v68_v28, 0.0004427343 }
  0x34   :  { %153 = vlog2.f32 %v71_v13  ;;  %v75_v29 = vadd.f32 1.0, %v74_v22  ;;  %vm78_vm5 = vcmp.lt.f32.partialorder %v77_v32, 0.0004427343 }
  0x35   :  { %v67_v33 = vmul.f32 %v148_v9, %v66_v23 }
  0x36   :  { %v76_v38 = vmul.f32 %v150_v11, %v75_v29 }
  0x40   :  { %v152_v36 = vpop.eup %151 }
  0x41   :  { %v154_v39 = vpop.eup %153  ;;  %v64_v41 = vmul.f32 0.6931472, %v152_v36 }
  0x42   :  { %v73_v42 = vmul.f32 0.6931472, %v154_v39 }
  0x43   :  { %v70_v43 = vsel %vm69_vm4, %v67_v33, %v64_v41 }
  0x44   :  { %v79_v46 = vsel %vm78_vm5, %v76_v38, %v73_v42  ;;  %v80_v47 = vadd.f32 %v70_v43, %v52_v37 }
  0x45   :  { %v81_v48 = vadd.f32 %v79_v46, %v53_v40 }
  0x46   :  { %v100_v49 = vsel %vm44_vm0, %v80_v47, 0.0  ;;  %v109_v50 = vsel %vm46_vm2, %v80_v47, 0.0 }
  0x47   :  { %v101_v53 = vsel %vm45_vm1, %v81_v48, 0.0  ;;  %v110_v54 = vsel %vm47_vm3, %v81_v48, 0.0 }
  0x48   :  { %v102_v55 = vadd.f32 %v101_v53, %v100_v49  ;;  %v111_v56 = vadd.f32 %v110_v54, %v109_v50 }
  0x4a   :  { %v103_v57 = vrot.slane %v102_v55, 4  ;;  %v112_v58 = vrot.slane %v111_v56, 4 }
  0x4c   :  { %v104_v61 = vadd.f32 %v103_v57, %v102_v55  ;;  %v113_v62 = vadd.f32 %v112_v58, %v111_v56 }
  0x4e   :  { %v105_v63 = vrot.slane %v104_v61, 2  ;;  %v114_v0 = vrot.slane %v113_v62, 2 }
  0x50   :  { %v106_v3 = vadd.f32 %v105_v63, %v104_v61  ;;  %v115_v4 = vadd.f32 %v114_v0, %v113_v62 }
  0x52   :  { %v107_v5 = vrot.slane %v106_v3, 1  ;;  %v116_v6 = vrot.slane %v115_v4, 1 }
  0x54   :  { %v108_v8 = vadd.f32 %v107_v5, %v106_v3  ;;  %v117_v9 = vadd.f32 %v116_v6, %v115_v4 }
  0x56   :  { %v121_v10 = vsel %vm120_vm7, %v119_v7, %v108_v8 }
  0x57   :  { %v123_v11 = vsel %vm122_vm8, %v121_v10, %v117_v9 }
  0x58   :  { %124 = vst [vmem:[#allocation7] sm:$0xf] %v123_v11 }
  0x59   :  { %206 = shalt.err (!%p203_p0)
}
  0x5a   :  { %134 = dma.vmem_to_hbm [thread:$0]  %s132_s1, 64, %s261_s2, [#allocation4]  }
  0x5b   :  { %219 = dma.done.wait [#allocation4], 64  }
  0x5c   :  { %220 = vsyncadd [#allocation4], 4294967232 }
  0x5d   :  { %138 = vsyncpa [#allocation3], 1 }
  0x5e   :  { %139 = vsyncpa [#allocation6], 1 }
  0x5f   :  { %140 = vsyncpa [#allocation4], 1 }

</bundles_post_ra>
